<compile_context>
chip_gen: v6e
topology: v6e:2x2x1
jax: 0.10.0
libtpu: 0.0.40
codegen_flags: <defaults>
</compile_context>

<pallas_src>
import jax
import jax.numpy as jnp
from jax.experimental import pallas as pl
from jax.experimental.pallas import tpu as pltpu

LANES = 128
SUBLANES = 8
MIN_PAD = SUBLANES * LANES  # 1024: minimum (8, 128) output-tile granularity


def mlp_kernel(x_ref, w1_ref, b1_ref, w2_ref, b2_ref, o_ref):
    """Full MLP forward for one batch tile, computed on the VPU.

    x_ref : (d_in, SB, 128) VMEM (bf16 or f32) - batch dense on sublanes+lanes
    w1_ref: (d_in, H) SMEM f32   - layer-1 weights (scalars)
    b1_ref: (H,)      SMEM f32
    w2_ref: (H,)      SMEM f32   - layer-2 weights (d_out == 1)
    b2_ref: (1,)      SMEM f32
    o_ref : (SB, 128) VMEM f32   - lane-dense sigmoid output slab
    """
    d_in, sb, _ = x_ref.shape
    hidden = b1_ref.shape[0]

    # Hoist all SMEM scalar reads out of the chunk loop (loop-invariant).
    w1 = [[w1_ref[i, j] for j in range(hidden)] for i in range(d_in)]
    b1 = [b1_ref[j] for j in range(hidden)]
    w2 = [w2_ref[j] for j in range(hidden)]
    b2 = b2_ref[0]

    # Inner chunk loop keeps vreg pressure low even for very large tiles:
    # each step loads d_in small slabs, computes, stores one output slab.
    chunk = 16 if sb % 16 == 0 else SUBLANES   # sb is always a multiple of 8
    n_chunks = sb // chunk

    @pl.loop(0, n_chunks)
    def _(c):
        r = pl.multiple_of(c * chunk, chunk)
        xs = [x_ref[i, pl.ds(r, chunk), :].astype(jnp.float32)
              for i in range(d_in)]
        z = None
        for j in range(hidden):                      # fully unrolled H*d_in FMAs
            h = w1[0][j] * xs[0]
            for i in range(1, d_in):
                h = h + w1[i][j] * xs[i]
            h = jnp.maximum(h + b1[j], 0.0)          # ReLU
            zj = w2[j] * h
            z = zj if z is None else z + zj
        z = z + b2
        # sigmoid(z) == 0.5 * tanh(z / 2) + 0.5  (exact identity, one EUP op)
        o_ref[pl.ds(r, chunk), :] = 0.5 * jnp.tanh(0.5 * z) + 0.5


def neural_network_forward(x, params, *, tile_b=131072,
                           input_dtype=jnp.bfloat16):
    """x: (batch, *) -> flattened to (batch, dim_input). Returns (batch, 1) f32.

    `input_dtype=bf16` (default) halves HBM traffic for both the wrapper-side
    layout plumbing and the kernel reads; pass None to keep x's dtype (e.g. for
    strict-f32 runs). In-kernel math is always f32.
    """
    w1, b1, w2, b2 = params
    batch = x.shape[0]
    x2d = x.reshape(batch, -1)                       # nn.Flatten
    d_in, hidden = w1.shape

    if x2d.shape[1] != d_in:
        raise ValueError(
            f"flattened feature count {x2d.shape[1]} != w1 fan-in {d_in}")
    if w2.shape != (hidden, 1) or b1.shape != (hidden,) or b2.shape != (1,):
        raise ValueError("parameter shapes do not match the 6->6->1 network")

    # Cast BEFORE the transpose/pad so the materialized layout pass moves half
    # the bytes (review item #1/#2).
    if input_dtype is not None and x2d.dtype != input_dtype:
        x2d = x2d.astype(input_dtype)

    # Pad only to the 1024-row output-tile granularity, never to a full tile_b
    # multiple (review item #8): waste is < one (8,128) row group.
    b_pad = pl.cdiv(batch, MIN_PAD) * MIN_PAD
    if b_pad != batch:
        x2d = jnp.pad(x2d, ((0, b_pad - batch), (0, 0)))

    # Tile sizing: large tiles amortize the ~0.35us/step pipeline overhead, but
    # clamp to the (padded) batch and force >=2 grid steps when possible so a
    # v7x chip can spread the "parallel" axis over both TensorCores.
    tile_b = max(MIN_PAD, (int(tile_b) // MIN_PAD) * MIN_PAD)
    tile_b = min(tile_b, b_pad)
    if b_pad > MIN_PAD and tile_b == b_pad:
        tile_b = max(MIN_PAD, (b_pad // 2 // MIN_PAD) * MIN_PAD)

    # Layout plumbing: batch on (sublane, lane), channel leading.
    x_t = x2d.T.reshape(d_in, b_pad // LANES, LANES)
    sb_tile = tile_b // LANES
    grid = (pl.cdiv(b_pad, tile_b),)

    itemsize = jnp.dtype(x2d.dtype).itemsize
    cost = pl.CostEstimate(
        flops=int(b_pad * (2 * d_in * hidden + 3 * hidden + 2)),
        transcendentals=int(b_pad),
        bytes_accessed=int(b_pad * d_in * itemsize + b_pad * 4 + 256),
    )

    out = pl.pallas_call(
        mlp_kernel,
        out_shape=jax.ShapeDtypeStruct((b_pad // LANES, LANES), jnp.float32),
        grid=grid,
        in_specs=[
            pl.BlockSpec((d_in, sb_tile, LANES), lambda i: (0, i, 0)),
            pl.BlockSpec(memory_space=pltpu.MemorySpace.SMEM),   # w1
            pl.BlockSpec(memory_space=pltpu.MemorySpace.SMEM),   # b1
            pl.BlockSpec(memory_space=pltpu.MemorySpace.SMEM),   # w2 (flattened)
            pl.BlockSpec(memory_space=pltpu.MemorySpace.SMEM),   # b2
        ],
        out_specs=pl.BlockSpec((sb_tile, LANES), lambda i: (i, 0)),
        compiler_params=pltpu.CompilerParams(
            dimension_semantics=("parallel",)),
        cost_estimate=cost,
    )(
        x_t,
        w1.astype(jnp.float32),
        b1.astype(jnp.float32),
        w2[:, 0].astype(jnp.float32),
        b2.astype(jnp.float32),
    )

    # (b_pad/128, 128) -> (b_pad, 1) is a contiguous (free) reshape.
    return out.reshape(b_pad, 1)[:batch]


def init_params(key, dim_input=6, hidden=6, dim_out=1):
    """Deterministic init mimicking torch.nn.Linear (uniform +-1/sqrt(fan_in)).
    Weights stored as (in, out) so the forward computes x @ W (== torch x @ W.T)."""
    k1, k2, k3, k4 = jax.random.split(key, 4)
    lim1 = 1.0 / jnp.sqrt(jnp.float32(dim_input))
    lim2 = 1.0 / jnp.sqrt(jnp.float32(hidden))
    w1 = jax.random.uniform(k1, (dim_input, hidden), jnp.float32, -lim1, lim1)
    b1 = jax.random.uniform(k2, (hidden,), jnp.float32, -lim1, lim1)
    w2 = jax.random.uniform(k3, (hidden, dim_out), jnp.float32, -lim2, lim2)
    b2 = jax.random.uniform(k4, (dim_out,), jnp.float32, -lim2, lim2)
    return w1, b1, w2, b2


if __name__ == "__main__":
    key = jax.random.PRNGKey(0)
    k_x, k_p = jax.random.split(key)

    batch, dim_input = 2000, 6            # pads to 2048 -> 2 grid steps of 1024
    x = jax.random.normal(k_x, (batch, dim_input), dtype=jnp.float32)
    params = init_params(k_p, dim_input=dim_input, hidden=6, dim_out=1)

    out = neural_network_forward(x, params)            # bf16 input path (default)
    out = jax.block_until_ready(out)
    assert out.shape == (batch, 1)

    w1, b1, w2, b2 = params

    # (a) Tight check of the kernel math itself: reference computed in f32 from
    #     the same bf16-rounded inputs the kernel sees.
    xq = x.astype(jnp.bfloat16).astype(jnp.float32)
    ref_q = jax.nn.sigmoid(jnp.maximum(xq @ w1 + b1[None, :], 0.0) @ w2 + b2[None, :])
    assert jnp.allclose(out, ref_q, atol=5e-4, rtol=1e-4), float(
        jnp.max(jnp.abs(out - ref_q)))

    # (b) Module-semantics check against the full-f32 reference; tolerance covers
    #     the bf16 input quantization only (kernel math is f32, sigmoid is exact).
    ref_f = jax.nn.sigmoid(jnp.maximum(x @ w1 + b1[None, :], 0.0) @ w2 + b2[None, :])
    assert jnp.allclose(out, ref_f, atol=2e-2, rtol=0.0), float(
        jnp.max(jnp.abs(out - ref_f)))

    print("KERNEL_OK")
</pallas_src>

<mosaic_0001>
module attributes {stable_mosaic.version = 11 : i64} {
  func.func @mlp_kernel(%arg0: i32, %arg1: memref<6x8x128xbf16, #tpu.memory_space<vmem>>, %arg2: memref<6x6xf32, #tpu.memory_space<smem>>, %arg3: memref<6xf32, #tpu.memory_space<smem>>, %arg4: memref<6xf32, #tpu.memory_space<smem>>, %arg5: memref<1xf32, #tpu.memory_space<smem>>, %arg6: memref<8x128xf32, #tpu.memory_space<vmem>>) attributes {dimension_semantics = [#tpu.dimension_semantics<parallel>], iteration_bounds = array<i64: 2>, scalar_prefetch = 0 : i64, scratch_operands = 0 : i64, tpu.core_type = #tpu.core_type<tc>, window_params = [{transform_indices = @transform_0, window_bounds = array<i64: 6, 8, 128>}, {transform_indices = @transform_1, window_bounds = array<i64: 6, 6>}, {transform_indices = @transform_2, window_bounds = array<i64: 6>}, {transform_indices = @transform_3, window_bounds = array<i64: 6>}, {transform_indices = @transform_4, window_bounds = array<i64: 1>}, {transform_indices = @transform_5, window_bounds = array<i64: 8, 128>}]} {
    %c0 = arith.constant 0 : index
    %c0_0 = arith.constant 0 : index
    %0 = memref.load %arg2[%c0, %c0_0] : memref<6x6xf32, #tpu.memory_space<smem>>
    %c0_1 = arith.constant 0 : index
    %c1 = arith.constant 1 : index
    %1 = memref.load %arg2[%c0_1, %c1] : memref<6x6xf32, #tpu.memory_space<smem>>
    %c0_2 = arith.constant 0 : index
    %c2 = arith.constant 2 : index
    %2 = memref.load %arg2[%c0_2, %c2] : memref<6x6xf32, #tpu.memory_space<smem>>
    %c0_3 = arith.constant 0 : index
    %c3 = arith.constant 3 : index
    %3 = memref.load %arg2[%c0_3, %c3] : memref<6x6xf32, #tpu.memory_space<smem>>
    %c0_4 = arith.constant 0 : index
    %c4 = arith.constant 4 : index
    %4 = memref.load %arg2[%c0_4, %c4] : memref<6x6xf32, #tpu.memory_space<smem>>
    %c0_5 = arith.constant 0 : index
    %c5 = arith.constant 5 : index
    %5 = memref.load %arg2[%c0_5, %c5] : memref<6x6xf32, #tpu.memory_space<smem>>
    %c1_6 = arith.constant 1 : index
    %c0_7 = arith.constant 0 : index
    %6 = memref.load %arg2[%c1_6, %c0_7] : memref<6x6xf32, #tpu.memory_space<smem>>
    %c1_8 = arith.constant 1 : index
    %c1_9 = arith.constant 1 : index
    %7 = memref.load %arg2[%c1_8, %c1_9] : memref<6x6xf32, #tpu.memory_space<smem>>
    %c1_10 = arith.constant 1 : index
    %c2_11 = arith.constant 2 : index
    %8 = memref.load %arg2[%c1_10, %c2_11] : memref<6x6xf32, #tpu.memory_space<smem>>
    %c1_12 = arith.constant 1 : index
    %c3_13 = arith.constant 3 : index
    %9 = memref.load %arg2[%c1_12, %c3_13] : memref<6x6xf32, #tpu.memory_space<smem>>
    %c1_14 = arith.constant 1 : index
    %c4_15 = arith.constant 4 : index
    %10 = memref.load %arg2[%c1_14, %c4_15] : memref<6x6xf32, #tpu.memory_space<smem>>
    %c1_16 = arith.constant 1 : index
    %c5_17 = arith.constant 5 : index
    %11 = memref.load %arg2[%c1_16, %c5_17] : memref<6x6xf32, #tpu.memory_space<smem>>
    %c2_18 = arith.constant 2 : index
    %c0_19 = arith.constant 0 : index
    %12 = memref.load %arg2[%c2_18, %c0_19] : memref<6x6xf32, #tpu.memory_space<smem>>
    %c2_20 = arith.constant 2 : index
    %c1_21 = arith.constant 1 : index
    %13 = memref.load %arg2[%c2_20, %c1_21] : memref<6x6xf32, #tpu.memory_space<smem>>
    %c2_22 = arith.constant 2 : index
    %c2_23 = arith.constant 2 : index
    %14 = memref.load %arg2[%c2_22, %c2_23] : memref<6x6xf32, #tpu.memory_space<smem>>
    %c2_24 = arith.constant 2 : index
    %c3_25 = arith.constant 3 : index
    %15 = memref.load %arg2[%c2_24, %c3_25] : memref<6x6xf32, #tpu.memory_space<smem>>
    %c2_26 = arith.constant 2 : index
    %c4_27 = arith.constant 4 : index
    %16 = memref.load %arg2[%c2_26, %c4_27] : memref<6x6xf32, #tpu.memory_space<smem>>
    %c2_28 = arith.constant 2 : index
    %c5_29 = arith.constant 5 : index
    %17 = memref.load %arg2[%c2_28, %c5_29] : memref<6x6xf32, #tpu.memory_space<smem>>
    %c3_30 = arith.constant 3 : index
    %c0_31 = arith.constant 0 : index
    %18 = memref.load %arg2[%c3_30, %c0_31] : memref<6x6xf32, #tpu.memory_space<smem>>
    %c3_32 = arith.constant 3 : index
    %c1_33 = arith.constant 1 : index
    %19 = memref.load %arg2[%c3_32, %c1_33] : memref<6x6xf32, #tpu.memory_space<smem>>
    %c3_34 = arith.constant 3 : index
    %c2_35 = arith.constant 2 : index
    %20 = memref.load %arg2[%c3_34, %c2_35] : memref<6x6xf32, #tpu.memory_space<smem>>
    %c3_36 = arith.constant 3 : index
    %c3_37 = arith.constant 3 : index
    %21 = memref.load %arg2[%c3_36, %c3_37] : memref<6x6xf32, #tpu.memory_space<smem>>
    %c3_38 = arith.constant 3 : index
    %c4_39 = arith.constant 4 : index
    %22 = memref.load %arg2[%c3_38, %c4_39] : memref<6x6xf32, #tpu.memory_space<smem>>
    %c3_40 = arith.constant 3 : index
    %c5_41 = arith.constant 5 : index
    %23 = memref.load %arg2[%c3_40, %c5_41] : memref<6x6xf32, #tpu.memory_space<smem>>
    %c4_42 = arith.constant 4 : index
    %c0_43 = arith.constant 0 : index
    %24 = memref.load %arg2[%c4_42, %c0_43] : memref<6x6xf32, #tpu.memory_space<smem>>
    %c4_44 = arith.constant 4 : index
    %c1_45 = arith.constant 1 : index
    %25 = memref.load %arg2[%c4_44, %c1_45] : memref<6x6xf32, #tpu.memory_space<smem>>
    %c4_46 = arith.constant 4 : index
    %c2_47 = arith.constant 2 : index
    %26 = memref.load %arg2[%c4_46, %c2_47] : memref<6x6xf32, #tpu.memory_space<smem>>
    %c4_48 = arith.constant 4 : index
    %c3_49 = arith.constant 3 : index
    %27 = memref.load %arg2[%c4_48, %c3_49] : memref<6x6xf32, #tpu.memory_space<smem>>
    %c4_50 = arith.constant 4 : index
    %c4_51 = arith.constant 4 : index
    %28 = memref.load %arg2[%c4_50, %c4_51] : memref<6x6xf32, #tpu.memory_space<smem>>
    %c4_52 = arith.constant 4 : index
    %c5_53 = arith.constant 5 : index
    %29 = memref.load %arg2[%c4_52, %c5_53] : memref<6x6xf32, #tpu.memory_space<smem>>
    %c5_54 = arith.constant 5 : index
    %c0_55 = arith.constant 0 : index
    %30 = memref.load %arg2[%c5_54, %c0_55] : memref<6x6xf32, #tpu.memory_space<smem>>
    %c5_56 = arith.constant 5 : index
    %c1_57 = arith.constant 1 : index
    %31 = memref.load %arg2[%c5_56, %c1_57] : memref<6x6xf32, #tpu.memory_space<smem>>
    %c5_58 = arith.constant 5 : index
    %c2_59 = arith.constant 2 : index
    %32 = memref.load %arg2[%c5_58, %c2_59] : memref<6x6xf32, #tpu.memory_space<smem>>
    %c5_60 = arith.constant 5 : index
    %c3_61 = arith.constant 3 : index
    %33 = memref.load %arg2[%c5_60, %c3_61] : memref<6x6xf32, #tpu.memory_space<smem>>
    %c5_62 = arith.constant 5 : index
    %c4_63 = arith.constant 4 : index
    %34 = memref.load %arg2[%c5_62, %c4_63] : memref<6x6xf32, #tpu.memory_space<smem>>
    %c5_64 = arith.constant 5 : index
    %c5_65 = arith.constant 5 : index
    %35 = memref.load %arg2[%c5_64, %c5_65] : memref<6x6xf32, #tpu.memory_space<smem>>
    %c0_66 = arith.constant 0 : index
    %36 = memref.load %arg3[%c0_66] : memref<6xf32, #tpu.memory_space<smem>>
    %c1_67 = arith.constant 1 : index
    %37 = memref.load %arg3[%c1_67] : memref<6xf32, #tpu.memory_space<smem>>
    %c2_68 = arith.constant 2 : index
    %38 = memref.load %arg3[%c2_68] : memref<6xf32, #tpu.memory_space<smem>>
    %c3_69 = arith.constant 3 : index
    %39 = memref.load %arg3[%c3_69] : memref<6xf32, #tpu.memory_space<smem>>
    %c4_70 = arith.constant 4 : index
    %40 = memref.load %arg3[%c4_70] : memref<6xf32, #tpu.memory_space<smem>>
    %c5_71 = arith.constant 5 : index
    %41 = memref.load %arg3[%c5_71] : memref<6xf32, #tpu.memory_space<smem>>
    %c0_72 = arith.constant 0 : index
    %42 = memref.load %arg4[%c0_72] : memref<6xf32, #tpu.memory_space<smem>>
    %c1_73 = arith.constant 1 : index
    %43 = memref.load %arg4[%c1_73] : memref<6xf32, #tpu.memory_space<smem>>
    %c2_74 = arith.constant 2 : index
    %44 = memref.load %arg4[%c2_74] : memref<6xf32, #tpu.memory_space<smem>>
    %c3_75 = arith.constant 3 : index
    %45 = memref.load %arg4[%c3_75] : memref<6xf32, #tpu.memory_space<smem>>
    %c4_76 = arith.constant 4 : index
    %46 = memref.load %arg4[%c4_76] : memref<6xf32, #tpu.memory_space<smem>>
    %c5_77 = arith.constant 5 : index
    %47 = memref.load %arg4[%c5_77] : memref<6xf32, #tpu.memory_space<smem>>
    %c0_78 = arith.constant 0 : index
    %48 = memref.load %arg5[%c0_78] : memref<1xf32, #tpu.memory_space<smem>>
    %c0_i32 = arith.constant 0 : i32
    %c1_i32 = arith.constant 1 : i32
    %49 = arith.muli %c0_i32, %c1_i32 : i32
    %c0_i32_79 = arith.constant 0 : i32
    %50 = arith.addi %c0_i32_79, %49 : i32
    %c8_i32 = arith.constant 8 : i32
    %51 = arith.muli %50, %c8_i32 : i32
    %52 = tpu.assume_multiple %51, 8 : i32
    %c0_80 = arith.constant 0 : index
    %53 = arith.index_cast %52 : i32 to index
    %c0_81 = arith.constant 0 : index
    %54 = vector.load %arg1[%c0_80, %53, %c0_81] : memref<6x8x128xbf16, #tpu.memory_space<vmem>>, vector<1x8x128xbf16>
    %55 = vector.shape_cast %54 : vector<1x8x128xbf16> to vector<8x128xbf16>
    %56 = arith.extf %55 : vector<8x128xbf16> to vector<8x128xf32>
    %c1_82 = arith.constant 1 : index
    %57 = arith.index_cast %52 : i32 to index
    %c0_83 = arith.constant 0 : index
    %58 = vector.load %arg1[%c1_82, %57, %c0_83] : memref<6x8x128xbf16, #tpu.memory_space<vmem>>, vector<1x8x128xbf16>
    %59 = vector.shape_cast %58 : vector<1x8x128xbf16> to vector<8x128xbf16>
    %60 = arith.extf %59 : vector<8x128xbf16> to vector<8x128xf32>
    %c2_84 = arith.constant 2 : index
    %61 = arith.index_cast %52 : i32 to index
    %c0_85 = arith.constant 0 : index
    %62 = vector.load %arg1[%c2_84, %61, %c0_85] : memref<6x8x128xbf16, #tpu.memory_space<vmem>>, vector<1x8x128xbf16>
    %63 = vector.shape_cast %62 : vector<1x8x128xbf16> to vector<8x128xbf16>
    %64 = arith.extf %63 : vector<8x128xbf16> to vector<8x128xf32>
    %c3_86 = arith.constant 3 : index
    %65 = arith.index_cast %52 : i32 to index
    %c0_87 = arith.constant 0 : index
    %66 = vector.load %arg1[%c3_86, %65, %c0_87] : memref<6x8x128xbf16, #tpu.memory_space<vmem>>, vector<1x8x128xbf16>
    %67 = vector.shape_cast %66 : vector<1x8x128xbf16> to vector<8x128xbf16>
    %68 = arith.extf %67 : vector<8x128xbf16> to vector<8x128xf32>
    %c4_88 = arith.constant 4 : index
    %69 = arith.index_cast %52 : i32 to index
    %c0_89 = arith.constant 0 : index
    %70 = vector.load %arg1[%c4_88, %69, %c0_89] : memref<6x8x128xbf16, #tpu.memory_space<vmem>>, vector<1x8x128xbf16>
    %71 = vector.shape_cast %70 : vector<1x8x128xbf16> to vector<8x128xbf16>
    %72 = arith.extf %71 : vector<8x128xbf16> to vector<8x128xf32>
    %c5_90 = arith.constant 5 : index
    %73 = arith.index_cast %52 : i32 to index
    %c0_91 = arith.constant 0 : index
    %74 = vector.load %arg1[%c5_90, %73, %c0_91] : memref<6x8x128xbf16, #tpu.memory_space<vmem>>, vector<1x8x128xbf16>
    %75 = vector.shape_cast %74 : vector<1x8x128xbf16> to vector<8x128xbf16>
    %76 = arith.extf %75 : vector<8x128xbf16> to vector<8x128xf32>
    %77 = vector.broadcast %0 : f32 to vector<8x128xf32>
    %78 = arith.mulf %77, %56 : vector<8x128xf32>
    %79 = vector.broadcast %6 : f32 to vector<8x128xf32>
    %80 = arith.mulf %79, %60 : vector<8x128xf32>
    %81 = arith.addf %78, %80 : vector<8x128xf32>
    %82 = vector.broadcast %12 : f32 to vector<8x128xf32>
    %83 = arith.mulf %82, %64 : vector<8x128xf32>
    %84 = arith.addf %81, %83 : vector<8x128xf32>
    %85 = vector.broadcast %18 : f32 to vector<8x128xf32>
    %86 = arith.mulf %85, %68 : vector<8x128xf32>
    %87 = arith.addf %84, %86 : vector<8x128xf32>
    %88 = vector.broadcast %24 : f32 to vector<8x128xf32>
    %89 = arith.mulf %88, %72 : vector<8x128xf32>
    %90 = arith.addf %87, %89 : vector<8x128xf32>
    %91 = vector.broadcast %30 : f32 to vector<8x128xf32>
    %92 = arith.mulf %91, %76 : vector<8x128xf32>
    %93 = arith.addf %90, %92 : vector<8x128xf32>
    %94 = vector.broadcast %36 : f32 to vector<8x128xf32>
    %95 = arith.addf %93, %94 : vector<8x128xf32>
    %cst = arith.constant 0.000000e+00 : f32
    %96 = vector.broadcast %cst : f32 to vector<8x128xf32>
    %97 = arith.maximumf %95, %96 : vector<8x128xf32>
    %98 = vector.broadcast %42 : f32 to vector<8x128xf32>
    %99 = arith.mulf %98, %97 : vector<8x128xf32>
    %100 = vector.broadcast %1 : f32 to vector<8x128xf32>
    %101 = arith.mulf %100, %56 : vector<8x128xf32>
    %102 = vector.broadcast %7 : f32 to vector<8x128xf32>
    %103 = arith.mulf %102, %60 : vector<8x128xf32>
    %104 = arith.addf %101, %103 : vector<8x128xf32>
    %105 = vector.broadcast %13 : f32 to vector<8x128xf32>
    %106 = arith.mulf %105, %64 : vector<8x128xf32>
    %107 = arith.addf %104, %106 : vector<8x128xf32>
    %108 = vector.broadcast %19 : f32 to vector<8x128xf32>
    %109 = arith.mulf %108, %68 : vector<8x128xf32>
    %110 = arith.addf %107, %109 : vector<8x128xf32>
    %111 = vector.broadcast %25 : f32 to vector<8x128xf32>
    %112 = arith.mulf %111, %72 : vector<8x128xf32>
    %113 = arith.addf %110, %112 : vector<8x128xf32>
    %114 = vector.broadcast %31 : f32 to vector<8x128xf32>
    %115 = arith.mulf %114, %76 : vector<8x128xf32>
    %116 = arith.addf %113, %115 : vector<8x128xf32>
    %117 = vector.broadcast %37 : f32 to vector<8x128xf32>
    %118 = arith.addf %116, %117 : vector<8x128xf32>
    %cst_92 = arith.constant 0.000000e+00 : f32
    %119 = vector.broadcast %cst_92 : f32 to vector<8x128xf32>
    %120 = arith.maximumf %118, %119 : vector<8x128xf32>
    %121 = vector.broadcast %43 : f32 to vector<8x128xf32>
    %122 = arith.mulf %121, %120 : vector<8x128xf32>
    %123 = arith.addf %99, %122 : vector<8x128xf32>
    %124 = vector.broadcast %2 : f32 to vector<8x128xf32>
    %125 = arith.mulf %124, %56 : vector<8x128xf32>
    %126 = vector.broadcast %8 : f32 to vector<8x128xf32>
    %127 = arith.mulf %126, %60 : vector<8x128xf32>
    %128 = arith.addf %125, %127 : vector<8x128xf32>
    %129 = vector.broadcast %14 : f32 to vector<8x128xf32>
    %130 = arith.mulf %129, %64 : vector<8x128xf32>
    %131 = arith.addf %128, %130 : vector<8x128xf32>
    %132 = vector.broadcast %20 : f32 to vector<8x128xf32>
    %133 = arith.mulf %132, %68 : vector<8x128xf32>
    %134 = arith.addf %131, %133 : vector<8x128xf32>
    %135 = vector.broadcast %26 : f32 to vector<8x128xf32>
    %136 = arith.mulf %135, %72 : vector<8x128xf32>
    %137 = arith.addf %134, %136 : vector<8x128xf32>
    %138 = vector.broadcast %32 : f32 to vector<8x128xf32>
    %139 = arith.mulf %138, %76 : vector<8x128xf32>
    %140 = arith.addf %137, %139 : vector<8x128xf32>
    %141 = vector.broadcast %38 : f32 to vector<8x128xf32>
    %142 = arith.addf %140, %141 : vector<8x128xf32>
    %cst_93 = arith.constant 0.000000e+00 : f32
    %143 = vector.broadcast %cst_93 : f32 to vector<8x128xf32>
    %144 = arith.maximumf %142, %143 : vector<8x128xf32>
    %145 = vector.broadcast %44 : f32 to vector<8x128xf32>
    %146 = arith.mulf %145, %144 : vector<8x128xf32>
    %147 = arith.addf %123, %146 : vector<8x128xf32>
    %148 = vector.broadcast %3 : f32 to vector<8x128xf32>
    %149 = arith.mulf %148, %56 : vector<8x128xf32>
    %150 = vector.broadcast %9 : f32 to vector<8x128xf32>
    %151 = arith.mulf %150, %60 : vector<8x128xf32>
    %152 = arith.addf %149, %151 : vector<8x128xf32>
    %153 = vector.broadcast %15 : f32 to vector<8x128xf32>
    %154 = arith.mulf %153, %64 : vector<8x128xf32>
    %155 = arith.addf %152, %154 : vector<8x128xf32>
    %156 = vector.broadcast %21 : f32 to vector<8x128xf32>
    %157 = arith.mulf %156, %68 : vector<8x128xf32>
    %158 = arith.addf %155, %157 : vector<8x128xf32>
    %159 = vector.broadcast %27 : f32 to vector<8x128xf32>
    %160 = arith.mulf %159, %72 : vector<8x128xf32>
    %161 = arith.addf %158, %160 : vector<8x128xf32>
    %162 = vector.broadcast %33 : f32 to vector<8x128xf32>
    %163 = arith.mulf %162, %76 : vector<8x128xf32>
    %164 = arith.addf %161, %163 : vector<8x128xf32>
    %165 = vector.broadcast %39 : f32 to vector<8x128xf32>
    %166 = arith.addf %164, %165 : vector<8x128xf32>
    %cst_94 = arith.constant 0.000000e+00 : f32
    %167 = vector.broadcast %cst_94 : f32 to vector<8x128xf32>
    %168 = arith.maximumf %166, %167 : vector<8x128xf32>
    %169 = vector.broadcast %45 : f32 to vector<8x128xf32>
    %170 = arith.mulf %169, %168 : vector<8x128xf32>
    %171 = arith.addf %147, %170 : vector<8x128xf32>
    %172 = vector.broadcast %4 : f32 to vector<8x128xf32>
    %173 = arith.mulf %172, %56 : vector<8x128xf32>
    %174 = vector.broadcast %10 : f32 to vector<8x128xf32>
    %175 = arith.mulf %174, %60 : vector<8x128xf32>
    %176 = arith.addf %173, %175 : vector<8x128xf32>
    %177 = vector.broadcast %16 : f32 to vector<8x128xf32>
    %178 = arith.mulf %177, %64 : vector<8x128xf32>
    %179 = arith.addf %176, %178 : vector<8x128xf32>
    %180 = vector.broadcast %22 : f32 to vector<8x128xf32>
    %181 = arith.mulf %180, %68 : vector<8x128xf32>
    %182 = arith.addf %179, %181 : vector<8x128xf32>
    %183 = vector.broadcast %28 : f32 to vector<8x128xf32>
    %184 = arith.mulf %183, %72 : vector<8x128xf32>
    %185 = arith.addf %182, %184 : vector<8x128xf32>
    %186 = vector.broadcast %34 : f32 to vector<8x128xf32>
    %187 = arith.mulf %186, %76 : vector<8x128xf32>
    %188 = arith.addf %185, %187 : vector<8x128xf32>
    %189 = vector.broadcast %40 : f32 to vector<8x128xf32>
    %190 = arith.addf %188, %189 : vector<8x128xf32>
    %cst_95 = arith.constant 0.000000e+00 : f32
    %191 = vector.broadcast %cst_95 : f32 to vector<8x128xf32>
    %192 = arith.maximumf %190, %191 : vector<8x128xf32>
    %193 = vector.broadcast %46 : f32 to vector<8x128xf32>
    %194 = arith.mulf %193, %192 : vector<8x128xf32>
    %195 = arith.addf %171, %194 : vector<8x128xf32>
    %196 = vector.broadcast %5 : f32 to vector<8x128xf32>
    %197 = arith.mulf %196, %56 : vector<8x128xf32>
    %198 = vector.broadcast %11 : f32 to vector<8x128xf32>
    %199 = arith.mulf %198, %60 : vector<8x128xf32>
    %200 = arith.addf %197, %199 : vector<8x128xf32>
    %201 = vector.broadcast %17 : f32 to vector<8x128xf32>
    %202 = arith.mulf %201, %64 : vector<8x128xf32>
    %203 = arith.addf %200, %202 : vector<8x128xf32>
    %204 = vector.broadcast %23 : f32 to vector<8x128xf32>
    %205 = arith.mulf %204, %68 : vector<8x128xf32>
    %206 = arith.addf %203, %205 : vector<8x128xf32>
    %207 = vector.broadcast %29 : f32 to vector<8x128xf32>
    %208 = arith.mulf %207, %72 : vector<8x128xf32>
    %209 = arith.addf %206, %208 : vector<8x128xf32>
    %210 = vector.broadcast %35 : f32 to vector<8x128xf32>
    %211 = arith.mulf %210, %76 : vector<8x128xf32>
    %212 = arith.addf %209, %211 : vector<8x128xf32>
    %213 = vector.broadcast %41 : f32 to vector<8x128xf32>
    %214 = arith.addf %212, %213 : vector<8x128xf32>
    %cst_96 = arith.constant 0.000000e+00 : f32
    %215 = vector.broadcast %cst_96 : f32 to vector<8x128xf32>
    %216 = arith.maximumf %214, %215 : vector<8x128xf32>
    %217 = vector.broadcast %47 : f32 to vector<8x128xf32>
    %218 = arith.mulf %217, %216 : vector<8x128xf32>
    %219 = arith.addf %195, %218 : vector<8x128xf32>
    %220 = vector.broadcast %48 : f32 to vector<8x128xf32>
    %221 = arith.addf %219, %220 : vector<8x128xf32>
    %cst_97 = arith.constant 5.000000e-01 : f32
    %222 = vector.broadcast %cst_97 : f32 to vector<8x128xf32>
    %223 = arith.mulf %222, %221 : vector<8x128xf32>
    %224 = math.tanh %223 : vector<8x128xf32>
    %cst_98 = arith.constant 5.000000e-01 : f32
    %225 = vector.broadcast %cst_98 : f32 to vector<8x128xf32>
    %226 = arith.mulf %225, %224 : vector<8x128xf32>
    %cst_99 = arith.constant 5.000000e-01 : f32
    %227 = vector.broadcast %cst_99 : f32 to vector<8x128xf32>
    %228 = arith.addf %226, %227 : vector<8x128xf32>
    %229 = arith.index_cast %52 : i32 to index
    %c0_100 = arith.constant 0 : index
    %230 = vector.load %arg6[%229, %c0_100] : memref<8x128xf32, #tpu.memory_space<vmem>>, vector<8x128xf32>
    tpu.vector_store %arg6[%229, %c0_100], %228 {strides = array<i32>} : memref<8x128xf32, #tpu.memory_space<vmem>>, vector<8x128xf32>,
    %c1_i32_101 = arith.constant 1 : i32
    return
  }
  func.func @transform_0(%arg0: i32) -> (i32, i32, i32) {
    %c0_i32 = arith.constant 0 : i32
    %c0_i32_0 = arith.constant 0 : i32
    %c0_i32_1 = arith.constant 0 : i32
    return %c0_i32, %arg0, %c0_i32_0 : i32, i32, i32
  }
  func.func @transform_1(%arg0: i32) -> (i32, i32) {
    %c0_i32 = arith.constant 0 : i32
    %c0_i32_0 = arith.constant 0 : i32
    %c0_i32_1 = arith.constant 0 : i32
    return %c0_i32, %c0_i32_0 : i32, i32
  }
  func.func @transform_2(%arg0: i32) -> i32 {
    %c0_i32 = arith.constant 0 : i32
    %c0_i32_0 = arith.constant 0 : i32
    return %c0_i32 : i32
  }
  func.func @transform_3(%arg0: i32) -> i32 {
    %c0_i32 = arith.constant 0 : i32
    %c0_i32_0 = arith.constant 0 : i32
    return %c0_i32 : i32
  }
  func.func @transform_4(%arg0: i32) -> i32 {
    %c0_i32 = arith.constant 0 : i32
    %c0_i32_0 = arith.constant 0 : i32
    return %c0_i32 : i32
  }
  func.func @transform_5(%arg0: i32) -> (i32, i32) {
    %c0_i32 = arith.constant 0 : i32
    %c0_i32_0 = arith.constant 0 : i32
    return %arg0, %c0_i32 : i32, i32
  }
}

</mosaic_0001>

<bundles_post_ra>
// kernel: tpu_custom_call.1
= control target key start
LH: loop header
LB: loop body
LE: loop exit
PB: predicated region body
PF: predicated region fallthrough
CT: control target
= control target key end

     0   :  { %s1298_s0 = inlined_call_operand.hbm [shape: bf16[6,16,128], index: 0, kind: input, shape index: {}]   ;;  %s1299_s1 = inlined_call_operand.hbm [shape: f32[6,6], index: 1, kind: input, shape index: {}]   ;;  %s1300_s2 = inlined_call_operand.vmem [shape: f32[6], index: 2, kind: input, shape index: {}]   ;;  %s1301_s3 = inlined_call_operand.vmem [shape: f32[6], index: 3, kind: input, shape index: {}]   ;;  %s1302_s4 = inlined_call_operand.<no memory space> [shape: f32[1], index: 4, kind: input, shape index: {}]   ;;  %s1303_s5 = inlined_call_operand.hbm [shape: f32[16,128], index: 5, kind: output, shape index: {}]  }
   0x1   :  { %1309 = sst [smem:[#allocation18_spill]] %s1298_s0 }
   0x2   :  { %1310 = sst [smem:[#allocation19_spill]] %s1299_s1 }
   0x3   :  { %1311 = sst [smem:[#allocation20_spill]] %s1300_s2 }
   0x4   :  { %10 = sst [smem:[#allocation2]] %s1302_s4 }
   0x5   :  { %11 = vsyncpa [#allocation4], 0 }
   0x6   :  { %13 = vsyncpa [#allocation4 + $0x1], 0 }
   0x7   :  { %14 = vsyncpa [#allocation6], 0 }
   0x8   :  { %15 = vsyncpa [#allocation7], 0 }
   0x9   :  { %16 = vsyncpa [#allocation11], 0 }
   0xa   :  { %17 = vsyncpa [#allocation5], 0 }
   0xb   :  { %19 = vsyncpa [#allocation5 + $0x1], 0  ;;  %s976_s20 = smov 0   ;;  %s978_s21 = smov 0  }
   0xc   :  { %s980_s22 = smov 0   ;;  %s982_s23 = smov 0  }
   0xd LB: > { %s997_s4 = sadd.s32 4294967295, %s933_s23   ;;  %s624_s24 = sadd.s32 4294967294, %s933_s23   ;;  %s933_s23 = sphi %s982_s23, %s1338_s23   ;;  %s929_s22 = sphi %s980_s22, %s1337_s22   ;;  %s925_s21 = sphi %s978_s21, %s1336_s21   ;;  %s921_s20 = sphi %s976_s20, %s1335_s20  }
   0xe   : > { %s1001_s25 = sadd.s32 1, %s933_s23   ;;  %s32_s26 = sadd.s32 1, %s929_s22 }
   0xf   : > { %s29_s27 = ssub.s32 %s933_s23, %s1001_s25  ;;  %p39_p0 = scmp.ne.s32.totalorder %s929_s22, %s925_s21 }
  0x10   : > { %p30_p1 = scmp.eq.s32.totalorder %s29_s27, 0  ;;  %p40_p2 = scmp.eq.s32.totalorder %s933_s23, 0 }
  0x11   : > { %p45_p3 = scmp.ne.s32.totalorder %s925_s21, %s921_s20  ;;  %p1304_p4 = scmp.eq.s32.totalorder %s997_s4, 0 }
  0x12   : > { %s1013_s28 = scalar_select %p30_p1, %s929_s22, %s32_s26  }
  0x13   : > { %p1015_p5 = por %p40_p2, %p39_p0  ;;  %p1021_p6 = por %p1304_p4, %p45_p3 }
  0x14   : > { %p153_p7 = scmp.eq.s32.totalorder %s997_s4, 1  ;;  %p159_p8 = scmp.eq.s32.totalorder %s624_s24, 1 }
  0x15   : > { %s1313_s30 = scalar_select %p1021_p6, 1, 0 }
  0x16   : > { %p625_p9 = scmp.ge.s32.totalorder %s933_s23, 1  ;;  %p166_p10 = scmp.lt.s32.totalorder %s933_s23, 3 }
  0x17   : > { %p1028_p11 = por %p153_p7, %p39_p0  ;;  %p1032_p12 = por %p159_p8, %p45_p3 }
  0x18   : > { %p1036_p13 = pnand %p625_p9, %p166_p10  ;;  %p743_p4 = scmp.lt.s32.totalorder %s933_s23, 2 }
  0x19   : > { %s1314_s6 = scalar_select %p1028_p11, 1, 0 }
  0x1a   : > { %s1315_s7 = scalar_select %p1032_p12, 1, 0 }
  0x1b   : > { %s1316_s8 = scalar_select %p1036_p13, 1, 0 }
  0x1c   : > { %p722_p2 = pneg %p1036_p13  ;;  %s1317_s2 = sld [smem:[#allocation20_spill]] }
  0x1d   : > { %p1318_p0 = scmp.eq.s32.totalorder %s997_s4, 0  ;;  %p1055_p3 = pnand %p743_p4, %p1015_p5 }
  0x1e   : > { %s199_s16 = sshll.u32 %s1301_s3, 4  ;;  %s935_s17 = smov [#allocation8]   ;;  %s200_s16 = int_to_ptr.vmem [resolvable:$true] %s199_s16 }
  0x1f   : > { %p1049_p7 = pnand %p722_p2, %p1318_p0  ;;  %s1321_s1 = sld [smem:[#allocation19_spill]] }
  0x20   : > { %s1320_s13 = scalar_select %p1055_p3, 1, 0 }
  0x21   : > { %p801_p9 = pneg %p1049_p7 }
  0x22   : > { %s188_s11 = sshll.u32 %s1317_s2, 4  ;;  %s189_s11 = int_to_ptr.vmem [resolvable:$true] %s188_s11 }
  0x23   : > { %s799_s24 = scalar_lea.vmem %s189_s11, 16  ;;  %p807_p10 = scmp.lt.s32.totalorder %s189_s11, %s189_s11 }
  0x24   : > { %p800_p8 = scmp.ne.s32.totalorder %s189_s11, %s799_s24  ;;  %p808_p2 = scmp.lt.s32.totalorder %s799_s24, %s799_s24 }
  0x25   : > { %725 = dma.hbm_to_smem (!%p1049_p7), %s1321_s1, 128, %s935_s17, [#allocation6]  }
  0x26   : > { %p802_p4 = pnand %p801_p9, %p800_p8  ;;  %p809_p0 = por %p808_p2, %p807_p10 }
  0x28   : > { %p803_p5 = pneg %p802_p4 }
  0x2a   : > { %p810_p1 = pnand %p809_p0, %p803_p5 }
  0x2c   : > { %813 = shalt.err (!%p810_p1)
}
  0x2d   : > { %s936_s26 = smov [#allocation9]   ;;  %s814_s27 = scalar_lea.vmem %s200_s16, 16 }
  0x2e   : > { %728 = dma.vmem_to_smem (!%p1049_p7), %s189_s11, 16, %s936_s26, [#allocation7]  }
  0x2f   : > { %p815_p12 = scmp.ne.s32.totalorder %s200_s16, %s814_s27  ;;  %p822_p13 = scmp.lt.s32.totalorder %s200_s16, %s200_s16 }
  0x30   : > { %p823_p8 = scmp.lt.s32.totalorder %s814_s27, %s814_s27 }
  0x31   : > { %p817_p11 = pnand %p815_p12, %p801_p9 }
  0x32   : > { %p824_p4 = por %p823_p8, %p822_p13 }
  0x33   : > { %p818_p6 = pneg %p817_p11 }
  0x35   : > { %p825_p3 = pnand %p824_p4, %p818_p6 }
  0x37   : > { %828 = shalt.err (!%p825_p3)
}
  0x38   : > { %s937_s29 = smov [#allocation10]   ;;  %s213_s9 = sand.u32 1, %s929_s22  }
  0x39   : > { %731 = dma.vmem_to_smem (!%p1049_p7), %s200_s16, 16, %s937_s29, [#allocation11]  }
  0x3a   : > { %s630_s10 = sshll.u32 %s933_s23, 6  ;;  %s704_s11 = smul.u32 24, %s213_s9 }
  0x3b   : > { %s1322_s0 = sld [smem:[#allocation18_spill]]  ;;  %s1088_s12 = scalar_lea.sflag [#allocation4], %s213_s9 }
  0x3c   : > { %s217_s18 = scalar_lea.vmem [#allocation3], %s704_s11  ;;  %p1323_p11 = scmp.ne.s32.totalorder %s1320_s13, 0 }
  0x3d   : > { %s223_s19 = sshll.u32 %s217_s18, 4  ;;  %s1086_s19 = int_to_ptr.vmem [resolvable:$true] %s223_s19 }
  0x3e   : > { %p831_p12 = pneg %p1323_p11 }
  0x41   : > { %s1084_s17 = scalar_lea.hbm %s1322_s0, %s630_s10  ;;  %s834_s27 = scalar_lea.hbm %s1322_s0, 768 }
  0x42   : > { %s829_s24 = scalar_lea.hbm %s1084_s17, 384  ;;  %p835_p7 = scmp.lt.s32.totalorder %s1084_s17, %s1322_s0 }
  0x43   : > { %p830_p6 = scmp.ne.s32.totalorder %s1084_s17, %s829_s24  ;;  %p836_p3 = scmp.lt.s32.totalorder %s834_s27, %s829_s24 }
  0x45   : > { %p832_p13 = pnand %p831_p12, %p830_p6  ;;  %p837_p9 = por %p836_p3, %p835_p7 }
  0x47   : > { %p833_p1 = pneg %p832_p13 }
  0x49   : > { %p838_p5 = pnand %p837_p9, %p833_p1 }
  0x4b   : > { %841 = shalt.err (!%p838_p5)
}
  0x4c   : > { %s842_s9 = scalar_lea.vmem %s1086_s19, 384  ;;  %s938_s11 = smov [#allocation3]  }
  0x4d   : > { %p843_p10 = scmp.ne.s32.totalorder %s1086_s19, %s842_s9  ;;  %s847_s14 = sshll.u32 %s938_s11, 4  ;;  %s848_s14 = int_to_ptr.vmem [resolvable:$false] %s847_s14 }
  0x4e   : > { %s849_s15 = scalar_lea.vmem %s848_s14, 768  ;;  %p850_p8 = scmp.lt.s32.totalorder %s1086_s19, %s848_s14 }
  0x4f   : > { %p845_p2 = pnand %p843_p10, %p831_p12  ;;  %p851_p4 = scmp.lt.s32.totalorder %s849_s15, %s842_s9 }
  0x51   : > { %p846_p0 = pneg %p845_p2  ;;  %p852_p6 = por %p851_p4, %p850_p8 }
  0x53   : > { %p853_p13 = pnand %p852_p6, %p846_p0 }
  0x55   : > { %856 = shalt.err (!%p853_p13)
}
  0x56   : > { %s939_s18 = smov 128   ;;  %s940_s24 = smov 64  }
  0x57   : > { %s941_s16 = smov 4   ;;  %p1324_p12 = scmp.ne.s32.totalorder %s1316_s8, 0 }
  0x58   : > { %735 = dma.hbm_to_vmem [thread:$0]  (!%p1323_p11), %s1084_s17, 384, %s1086_s19, %s1088_s12, %s939_s18, %s940_s24, %s941_s16  }
  0x59   : > { %235 = sbr.rel (%p1324_p12) target bundleno = 205 (0xcd), region = 40  ;;  %s1112_s26 = sand.u32 (!%p1324_p12), 1, %s925_s21  }
  0x5a   : > { %s705_s27 = smul.u32 (!%p1324_p12), 24, %s1112_s26  ;;  %s238_s29 = scalar_lea.sflag (!%p1324_p12), [#allocation4], %s1112_s26 }
  0x5b   : > { %p1325_p1 = scmp.ne.s32.totalorder (!%p1324_p12), %s1313_s30, 0 }
  0x5c   : > { %s1116_s10 = scalar_lea.vmem (!%p1324_p12), [#allocation3], %s705_s27 }
  0x5e   : > { %900 = dma.done.wait (%p1325_p1), %s238_s29, 384  }
  0x5f   : > { %902 = vsyncadd (%p1325_p1), %s238_s29, 4294966912  ;;  %p1326_p11 = scmp.eq.s32.totalorder %s997_s4, 0 }
  0x61   : > { %904 = dma.done.wait (%p1326_p11), [#allocation6], 128   ;;  %p1327_p7 = pmov %p1326_p11 }
  0x63   : > { %906 = vsyncadd (%p1327_p7), [#allocation6], 4294967168  ;;  %p1328_p3 = pmov %p1327_p7 }
  0x65   : > { %908 = dma.done.wait (%p1328_p3), [#allocation7], 16   ;;  %p1329_p9 = pmov %p1328_p3 }
  0x66   : > { %p1330_p5 = pmov %p1328_p3 }
  0x67   : > { %910 = vsyncadd (%p1329_p9), [#allocation7], 4294967280 }
  0x68   : > { %912 = dma.done.wait (%p1330_p5), [#allocation11], 16   ;;  %p1331_p10 = pmov %p1328_p3 }
  0x6a   : > { %914 = vsyncadd (%p1331_p10), [#allocation11], 4294967280 }
  0x6b   : > { %258 = sfence }
  0x6c   : > { %s281_s30 = sld [smem:[#allocation8]]  ;;  %v691_v0 = vld [vmem:[%s1116_s10] sm:$0xff]   ;;  %v702_v1 = vld [vmem:[%s1116_s10 + $0x8] sm:$0xff]   ;;  %v703_v39 = vld [vmem:[%s1116_s10 + $0x10] sm:$0xff]   ;;  %p1332_p0 = scmp.ne.s32.totalorder %s1314_s6, 0 }
  0x6d   : > { %s1134_s8 = sld [smem:[#allocation8 + $0x1]]  ;;  %v692_v2 = vunpack.c.l.bf16 %v691_v0  ;;  %v693_v3 = vunpack.c.h.bf16 %v691_v0  ;;  %v696_v5 = vunpack.c.l.bf16 %v702_v1  ;;  %v1166_v7 = vunpack.c.h.bf16 %v702_v1 }
  0x6e   : > { %s1136_s13 = sld [smem:[#allocation8 + $0x2]]  ;;  %v700_v52 = vunpack.c.l.bf16 %v703_v39 }
  0x6f   : > { %s1138_s17 = sld [smem:[#allocation8 + $0x3]] }
  0x70   : > { %s1140_s19 = sld [smem:[#allocation8 + $0x4]] }
  0x71   : > { %s1142_s12 = sld [smem:[#allocation8 + $0x5]] }
  0x72   : > { %s641_s9 = sld [smem:[#allocation8 + $0x80]]  ;;  %v357_v4 = vstv %s281_s30 }
  0x73   : > { %s1144_s11 = sld [smem:[#allocation8 + $0x81]]  ;;  %v379_v8 = vstv %s1134_s8  ;;  %v358_v11 = vmul.f32 %v692_v2, %v357_v4 }
  0x74   : > { %s1146_s14 = sld [smem:[#allocation8 + $0x82]]  ;;  %v402_v10 = vstv %s1136_s13  ;;  %v380_v19 = vmul.f32 %v692_v2, %v379_v8 }
  0x75   : > { %s1148_s15 = sld [smem:[#allocation8 + $0x83]]  ;;  %v425_v13 = vstv %s1138_s17  ;;  %v403_v21 = vmul.f32 %v692_v2, %v402_v10 }
  0x76   : > { %s1150_s18 = sld [smem:[#allocation8 + $0x84]]  ;;  %v448_v16 = vstv %s1140_s19  ;;  %v426_v25 = vmul.f32 %v692_v2, %v425_v13 }
  0x77   : > { %s1153_s24 = sld [smem:[#allocation8 + $0x85]]  ;;  %v471_v18 = vstv %s1142_s12  ;;  %v449_v28 = vmul.f32 %v692_v2, %v448_v16 }
  0x78   : > { %s1155_s16 = sld [smem:[#allocation8 + $0x100]]  ;;  %v359_v6 = vstv %s641_s9  ;;  %v472_v30 = vmul.f32 %v692_v2, %v471_v18 }
  0x79   : > { %s1158_s27 = sld [smem:[#allocation8 + $0x101]]  ;;  %v381_v9 = vstv %s1144_s11  ;;  %v360_v15 = vmul.f32 %v693_v3, %v359_v6 }
  0x7a   : > { %s1160_s29 = sld [smem:[#allocation8 + $0x102]]  ;;  %v404_v12 = vstv %s1146_s14  ;;  %v382_v20 = vmul.f32 %v693_v3, %v381_v9 }
  0x7b   : > { %s1162_s0 = sld [smem:[#allocation8 + $0x103]]  ;;  %v427_v14 = vstv %s1148_s15  ;;  %v405_v24 = vmul.f32 %v693_v3, %v404_v12  ;;  %v361_v31 = vadd.f32 %v360_v15, %v358_v11  ;;  %v701_v12 = vunpack.c.h.bf16 %v703_v39 }
  0x7c   : > { %s1164_s1 = sld [smem:[#allocation8 + $0x104]]  ;;  %v450_v17 = vstv %s1150_s18  ;;  %v428_v26 = vmul.f32 %v693_v3, %v427_v14  ;;  %v383_v36 = vadd.f32 %v382_v20, %v380_v19 }
  0x7d   : > { %s1171_s2 = sld [smem:[#allocation8 + $0x105]]  ;;  %v473_v22 = vstv %s1153_s24  ;;  %v451_v29 = vmul.f32 %v693_v3, %v450_v17  ;;  %v406_v42 = vadd.f32 %v405_v24, %v403_v21 }
  0x7e   : > { %s1176_s30 = sld [smem:[#allocation8 + $0x180]]  ;;  %v362_v23 = vstv %s1155_s16  ;;  %v474_v34 = vmul.f32 %v693_v3, %v473_v22  ;;  %v429_v43 = vadd.f32 %v428_v26, %v426_v25 }
  0x7f   : > { %s1181_s9 = sld [smem:[#allocation8 + $0x181]]  ;;  %v384_v27 = vstv %s1158_s27  ;;  %v363_v35 = vmul.f32 %v696_v5, %v362_v23  ;;  %v452_v47 = vadd.f32 %v451_v29, %v449_v28 }
  0x80   : > { %s1184_s8 = sld [smem:[#allocation8 + $0x182]]  ;;  %v407_v32 = vstv %s1160_s29  ;;  %v385_v41 = vmul.f32 %v696_v5, %v384_v27  ;;  %v475_v50 = vadd.f32 %v474_v34, %v472_v30 }
  0x81   : > { %s1187_s13 = sld [smem:[#allocation8 + $0x183]]  ;;  %v430_v33 = vstv %s1162_s0  ;;  %v408_v45 = vmul.f32 %v696_v5, %v407_v32  ;;  %v364_v53 = vadd.f32 %v363_v35, %v361_v31 }
  0x82   : > { %s1190_s17 = sld [smem:[#allocation8 + $0x184]]  ;;  %v453_v37 = vstv %s1164_s1  ;;  %v431_v46 = vmul.f32 %v696_v5, %v430_v33  ;;  %v386_v56 = vadd.f32 %v385_v41, %v383_v36 }
  0x83   : > { %s1194_s19 = sld [smem:[#allocation8 + $0x185]]  ;;  %v476_v38 = vstv %s1171_s2  ;;  %v454_v49 = vmul.f32 %v696_v5, %v453_v37  ;;  %v409_v59 = vadd.f32 %v408_v45, %v406_v42 }
  0x84   : > { %s1198_s12 = sld [smem:[#allocation8 + $0x200]]  ;;  %v365_v40 = vstv %s1176_s30  ;;  %v477_v51 = vmul.f32 %v696_v5, %v476_v38  ;;  %v432_v61 = vadd.f32 %v431_v46, %v429_v43 }
  0x85   : > { %s1202_s11 = sld [smem:[#allocation8 + $0x201]]  ;;  %v387_v44 = vstv %s1181_s9  ;;  %v366_v54 = vmul.f32 %v1166_v7, %v365_v40  ;;  %v455_v1 = vadd.f32 %v454_v49, %v452_v47 }
  0x86   : > { %s1205_s0 = sld [smem:[#allocation8 + $0x202]]  ;;  %v410_v48 = vstv %s1184_s8  ;;  %v388_v57 = vmul.f32 %v1166_v7, %v387_v44  ;;  %v478_v2 = vadd.f32 %v477_v51, %v475_v50 }
  0x87   : > { %s1208_s1 = sld [smem:[#allocation8 + $0x203]]  ;;  %v433_v55 = vstv %s1187_s13  ;;  %v411_v60 = vmul.f32 %v1166_v7, %v410_v48  ;;  %v367_v3 = vadd.f32 %v366_v54, %v364_v53 }
  0x88   : > { %s1212_s2 = sld [smem:[#allocation8 + $0x204]]  ;;  %v456_v58 = vstv %s1190_s17  ;;  %v434_v0 = vmul.f32 %v1166_v7, %v433_v55  ;;  %v389_v8 = vadd.f32 %v388_v57, %v386_v56 }
  0x89   : > { %s1216_s10 = sld [smem:[#allocation8 + $0x205]]  ;;  %v479_v62 = vstv %s1194_s19  ;;  %v457_v6 = vmul.f32 %v1166_v7, %v456_v58  ;;  %v412_v13 = vadd.f32 %v411_v60, %v409_v59 }
  0x8a   : > { %s1220_s14 = sld [smem:[#allocation8 + $0x280]]  ;;  %v368_v63 = vstv %s1198_s12  ;;  %v480_v11 = vmul.f32 %v1166_v7, %v479_v62  ;;  %v435_v16 = vadd.f32 %v434_v0, %v432_v61 }
  0x8b   : > { %s1224_s15 = sld [smem:[#allocation8 + $0x281]]  ;;  %v369_v4 = vmul.f32 %v700_v52, %v368_v63  ;;  %v390_v5 = vstv %s1202_s11  ;;  %v458_v20 = vadd.f32 %v457_v6, %v455_v1 }
  0x8c   : > { %s1228_s18 = sld [smem:[#allocation8 + $0x282]]  ;;  %v391_v9 = vmul.f32 %v700_v52, %v390_v5  ;;  %v413_v10 = vstv %s1205_s0  ;;  %v481_v24 = vadd.f32 %v480_v11, %v478_v2 }
  0x8d   : > { %s1232_s24 = sld [smem:[#allocation8 + $0x283]]  ;;  %v414_v14 = vmul.f32 %v700_v52, %v413_v10  ;;  %v436_v15 = vstv %s1208_s1  ;;  %v370_v19 = vadd.f32 %v369_v4, %v367_v3 }
  0x8e   : > { %s1235_s16 = sld [smem:[#allocation8 + $0x284]]  ;;  %v437_v17 = vmul.f32 %v700_v52, %v436_v15  ;;  %v459_v18 = vstv %s1212_s2  ;;  %v392_v23 = vadd.f32 %v391_v9, %v389_v8 }
  0x8f   : > { %s1238_s27 = sld [smem:[#allocation8 + $0x285]]  ;;  %v460_v21 = vmul.f32 %v700_v52, %v459_v18  ;;  %v482_v7 = vstv %s1216_s10  ;;  %v415_v28 = vadd.f32 %v414_v14, %v412_v13 }
  0x90   : > { %s1241_s29 = sld [smem:[#allocation9]]  ;;  %v371_v22 = vstv %s1220_s14  ;;  %v483_v25 = vmul.f32 %v700_v52, %v482_v7  ;;  %v438_v31 = vadd.f32 %v437_v17, %v435_v16  ;;  %s635_s14 = sshll.u32 %s1112_s26, 3 }
  0x91   : > { %s1244_s30 = sld [smem:[#allocation9 + $0x1]]  ;;  %v372_v26 = vmul.f32 %v701_v12, %v371_v22  ;;  %v393_v27 = vstv %s1224_s15  ;;  %v461_v35 = vadd.f32 %v460_v21, %v458_v20  ;;  %s687_s15 = sshll.u32 %s997_s4, 7 }
  0x92   : > { %s1247_s9 = sld [smem:[#allocation9 + $0x2]]  ;;  %v394_v29 = vmul.f32 %v701_v12, %v393_v27  ;;  %v416_v30 = vstv %s1228_s18  ;;  %v484_v39 = vadd.f32 %v483_v25, %v481_v24  ;;  %s280_s18 = scalar_lea.vmem [#allocation12], %s635_s14 }
  0x93   : > { %s1250_s8 = sld [smem:[#allocation9 + $0x3]]  ;;  %v373_v32 = vadd.f32 %v372_v26, %v370_v19  ;;  %v417_v33 = vmul.f32 %v701_v12, %v416_v30  ;;  %v439_v34 = vstv %s1232_s24  ;;  %s515_s24 = sshll.u32 %s280_s18, 4  ;;  %s516_s24 = int_to_ptr.vmem [resolvable:$true] %s515_s24 }
  0x94   : > { %s1253_s13 = sld [smem:[#allocation9 + $0x4]]  ;;  %v395_v36 = vadd.f32 %v394_v29, %v392_v23  ;;  %v440_v37 = vmul.f32 %v701_v12, %v439_v34  ;;  %v462_v38 = vstv %s1235_s16 }
  0x95   : > { %s675_s17 = sld [smem:[#allocation9 + $0x5]]  ;;  %v418_v40 = vadd.f32 %v417_v33, %v415_v28  ;;  %v463_v41 = vmul.f32 %v701_v12, %v462_v38  ;;  %v485_v42 = vstv %s1238_s27 }
  0x96   : > { %s323_s19 = sld [smem:[#allocation10]]  ;;  %v374_v43 = vstv %s1241_s29  ;;  %v441_v44 = vadd.f32 %v440_v37, %v438_v31  ;;  %v486_v45 = vmul.f32 %v701_v12, %v485_v42  ;;  %s513_s29 = scalar_lea.hbm %s1303_s5, %s687_s15 }
  0x97   : > { %s676_s12 = sld [smem:[#allocation10 + $0x1]]  ;;  %v375_v46 = vadd.f32 %v374_v43, %v373_v32  ;;  %v396_v47 = vstv %s1244_s30  ;;  %v464_v48 = vadd.f32 %v463_v41, %v461_v35  ;;  %s502_s30 = scalar_lea.sflag [#allocation5], %s1112_s26 }
  0x98   : > { %s677_s11 = sld [smem:[#allocation10 + $0x2]]  ;;  %v397_v49 = vadd.f32 %v396_v47, %v395_v36  ;;  %v419_v50 = vstv %s1247_s9  ;;  %v487_v51 = vadd.f32 %v486_v45, %v484_v39  ;;  %s857_s9 = scalar_lea.vmem %s516_s24, 128 }
  0x99   : > { %s678_s0 = sld [smem:[#allocation10 + $0x3]]  ;;  %v376_v52 = vmax.f32 %v375_v46, 0.0  ;;  %v420_v53 = vadd.f32 %v419_v50, %v418_v40  ;;  %v442_v54 = vstv %s1250_s8  ;;  %p858_p2 = scmp.ne.s32.totalorder %s516_s24, %s857_s9 }
  0x9a   : > { %s679_s1 = sld [smem:[#allocation10 + $0x4]]  ;;  %v398_v55 = vmax.f32 %v397_v49, 0.0  ;;  %v443_v56 = vadd.f32 %v442_v54, %v441_v44  ;;  %v465_v57 = vstv %s1253_s13  ;;  %s942_s8 = smov [#allocation12]  }
  0x9b   : > { %s680_s2 = sld [smem:[#allocation10 + $0x5]]  ;;  %v421_v58 = vmax.f32 %v420_v53, 0.0  ;;  %v466_v59 = vadd.f32 %v465_v57, %v464_v48  ;;  %v488_v60 = vstv %s675_s17  ;;  %p859_p8 = pnand %p858_p2, %p1332_p0 }
  0x9c   : > { %v377_v61 = vstv %s323_s19  ;;  %v444_v62 = vmax.f32 %v443_v56, 0.0  ;;  %v489_v63 = vadd.f32 %v488_v60, %v487_v51  ;;  %s329_s10 = sld [smem:[#allocation2]]  ;;  %s861_s13 = sshll.u32 %s942_s8, 4  ;;  %s862_s13 = int_to_ptr.vmem [resolvable:$false] %s861_s13 }
  0x9d   : > { %v378_v0 = vmul.f32 %v377_v61, %v376_v52  ;;  %v399_v1 = vstv %s676_s12  ;;  %v467_v4 = vmax.f32 %v466_v59, 0.0  ;;  %p860_p4 = pneg %p859_p8  ;;  %s863_s4 = scalar_lea.vmem %s862_s13, 256 }
  0x9e   : > { %v400_v2 = vmul.f32 %v399_v1, %v398_v55  ;;  %v422_v3 = vstv %s677_s11  ;;  %v490_v11 = vmax.f32 %v489_v63, 0.0  ;;  %p864_p6 = scmp.lt.s32.totalorder %s516_s24, %s862_s13  ;;  %p865_p13 = scmp.lt.s32.totalorder %s863_s4, %s857_s9 }
  0x9f   : > { %v423_v5 = vmul.f32 %v422_v3, %v421_v58  ;;  %v445_v6 = vstv %s678_s0 }
  0xa0   : > { %v401_v8 = vadd.f32 %v400_v2, %v378_v0  ;;  %v446_v9 = vmul.f32 %v445_v6, %v444_v62  ;;  %v468_v10 = vstv %s679_s1  ;;  %p866_p12 = por %p865_p13, %p864_p6 }
  0xa1   : > { %v491_v12 = vstv %s680_s2  ;;  %v469_v14 = vmul.f32 %v468_v10, %v467_v4 }
  0xa2   : > { %v424_v13 = vadd.f32 %v423_v5, %v401_v8  ;;  %v492_v16 = vmul.f32 %v491_v12, %v490_v11  ;;  %v494_v18 = vstv %s329_s10  ;;  %p867_p1 = pnand %p866_p12, %p860_p4 }
  0xa4   : > { %v447_v15 = vadd.f32 %v446_v9, %v424_v13 }
  0xa6   : > { %v470_v17 = vadd.f32 %v469_v14, %v447_v15 }
  0xa8   : > { %v493_v19 = vadd.f32 %v492_v16, %v470_v17 }
  0xaa   : > { %v495_v20 = vadd.f32 %v494_v18, %v493_v19 }
  0xac   : > { %v496_v21 = vmul.f32 0.5, %v495_v20 }
  0xae   : > { %786 = vtanh.f32 %v496_v21 }
  0xbb   : > { %v787_v7 = vpop.eup %786 }
  0xbc   : > { %v498_v22 = vmul.f32 0.5, %v787_v7 }
  0xbe   : > { %v499_v23 = vadd.f32 0.5, %v498_v22 }
  0xc0   : > { %500 = vst [vmem:[%s280_s18] sm:$0xff] %v499_v23 }
  0xc1   : > { %870 = shalt.err (!%p867_p1)
}
  0xc2   : > { %s871_s17 = scalar_lea.hbm %s513_s29, 128  ;;  %s875_s12 = scalar_lea.hbm %s1303_s5, 256 }
  0xc3   : > { %p872_p11 = scmp.ne.s32.totalorder %s513_s29, %s871_s17  ;;  %p876_p9 = scmp.lt.s32.totalorder %s513_s29, %s1303_s5 }
  0xc4   : > { %p877_p5 = scmp.lt.s32.totalorder %s875_s12, %s871_s17 }
  0xc5   : > { %p873_p7 = pnand %p872_p11, %p1332_p0 }
  0xc6   : > { %p878_p10 = por %p877_p5, %p876_p9 }
  0xc7   : > { %p874_p3 = pneg %p873_p7 }
  0xc9   : > { %p879_p2 = pnand %p878_p10, %p874_p3 }
  0xcb   : > { %882 = shalt.err (!%p879_p2)
}
  0xcc   : > { %720 = dma.vmem_to_hbm [thread:$0]  (%p1332_p0), %s516_s24, 128, %s513_s29, %s502_s30  }
  0xcd PF: > { %s527_s1 = sand.u32 1, %s921_s20   ;;  %p1333_p8 = scmp.ne.s32.totalorder %s1315_s7, 0 }
  0xce   : > { %p1334_p4 = scmp.ge.s32.totalorder %s933_s23, 2  ;;  %s528_s2 = scalar_lea.sflag [#allocation5], %s527_s1 }
  0xd0   : > { %p737_p6 = pnand %p1334_p4, %p1333_p8 }
  0xd2   : > { %p738_p13 = pneg %p737_p6 }
  0xd4   : > { %916 = dma.done.wait (%p738_p13), %s528_s2, 128  }
  0xd5   : > { %918 = vsyncadd (%p738_p13), %s528_s2, 4294967168  ;;  %p22_p12 = scmp.ge.s32.totalorder %s1001_s25, 4   ;;  %s1335_s20 = smov %s925_s21 }
  0xd6   : > { %s1336_s21 = smov %s929_s22  ;;  %s1337_s22 = smov %s1013_s28 }
  0xd7   : > { %s1338_s23 = smov %s1001_s25  ;;  %24 = sbr.rel (!%p22_p12) target bundleno = 13 (0xd), region = 104 }
  0xdc   :  { %533 = vsyncpa [#allocation4], 1 }
  0xdd   :  { %535 = vsyncpa [#allocation4 + $0x1], 1 }
  0xde   :  { %536 = vsyncpa [#allocation5], 1 }
  0xdf   :  { %538 = vsyncpa [#allocation5 + $0x1], 1 }
  0xe0   :  { %539 = vsyncpa [#allocation6], 1 }
  0xe1   :  { %541 = vsyncpa [#allocation6 + $0x1], 1 }
  0xe2   :  { %542 = vsyncpa [#allocation7], 1 }
  0xe3   :  { %544 = vsyncpa [#allocation7 + $0x1], 1 }
  0xe4   :  { %545 = vsyncpa [#allocation11], 1 }

</bundles_post_ra>
